<compile_context>
chip_gen: v7x
topology: tpu7x:2x2x1
jax: 0.10.0
libtpu: 0.0.40
codegen_flags: <defaults>
</compile_context>

<pallas_src>
import math
import functools

import jax
import jax.numpy as jnp
from jax import lax
from jax.experimental import pallas as pl
from jax.experimental.pallas import tpu as pltpu


def _round_up(x, m):
    return ((x + m - 1) // m) * m


def adapter_kernel(x_ref, w1_ref, b1_ref, w2_ref, b2_ref, o_ref):
    """Fused LayerNorm -> Linear -> GELU -> Linear.

    LN affine is pre-folded into (w1, b1); the 0.7 output scale is pre-folded
    into (w2, b2).  Weights arrive in bf16; accumulation is f32.
    """
    x = x_ref[...].astype(jnp.float32)

    # One-pass LayerNorm statistics (biased variance, eps=1e-5: torch default).
    mean = jnp.mean(x, axis=-1, keepdims=True)
    ex2 = jnp.mean(x * x, axis=-1, keepdims=True)
    var = jnp.maximum(ex2 - mean * mean, 0.0)
    xn = (x - mean) * lax.rsqrt(var + 1e-5)

    # ln1: (TM, D) @ (D, R) + b1  -> MXU (bf16 operands, f32 accumulate).
    h = jnp.dot(xn.astype(w1_ref.dtype), w1_ref[...],
                preferred_element_type=jnp.float32)
    h = h + b1_ref[...]

    # Exact (erf-based) GELU, matching torch.nn.GELU default numerics.
    h = 0.5 * h * (1.0 + lax.erf(h * (1.0 / math.sqrt(2.0))))

    # TODO(synk): dropout(p=0.1) is identity in inference mode; training-mode
    # RNG mask (pltpu.prng_*) omitted.

    # ln2: (TM, R) @ (R, D) + b2 (0.7 already folded into w2/b2).
    out = jnp.dot(h.astype(w2_ref.dtype), w2_ref[...],
                  preferred_element_type=jnp.float32)
    out = out + b2_ref[...]
    o_ref[...] = out.astype(o_ref.dtype)


@functools.partial(jax.jit, static_argnames=("tm_cap",))
def adapter_forward(x, w1, b1, w2, b2, *, tm_cap=2048):
    """x: (B, N, D).  w1: (D, R) bf16, b1: (1, R) f32 (LN affine folded in),
    w2: (R, D) bf16, b2: (1, D) f32 (0.7 folded in).  Returns (B, N, D)."""
    B, N, D = x.shape
    M = B * N
    R = w1.shape[1]
    x2 = x.reshape(M, D)

    # ---- VMEM-aware row tile -------------------------------------------------
    bytes_x = jnp.dtype(x.dtype).itemsize
    bytes_out = bytes_x  # output dtype follows input dtype
    weight_bytes = int(w1.size * jnp.dtype(w1.dtype).itemsize
                       + w2.size * jnp.dtype(w2.dtype).itemsize
                       + b1.size * jnp.dtype(b1.dtype).itemsize
                       + b2.size * jnp.dtype(b2.dtype).itemsize)

    # Budget for the double-buffered x/out row tiles.  12 MiB keeps v5e's
    # 16 MiB scoped-VMEM default safe; v6e/v7x have plenty of headroom.
    pipeline_budget = 12 * 1024 * 1024
    per_row = 2 * (bytes_x + bytes_out) * D        # 2-deep buffers on x and out
    tm = max(8, (pipeline_budget // per_row) // 8 * 8)
    TM = int(min(tm, tm_cap, _round_up(M, 8)))
    grid = (pl.cdiv(M, TM),)                       # ragged last block is masked

    # Explicit scoped-VMEM limit: pipelined row tiles + (up to 2x) weights.
    vmem_need = per_row * TM + 2 * weight_bytes
    vmem_limit = int(min(max(vmem_need + (4 << 20), 32 << 20), 56 << 20))

    # ---- BlockSpecs ----------------------------------------------------------
    row_spec = pl.BlockSpec((TM, D), lambda i: (i, 0))
    # Constant-index inputs stay VMEM-resident across grid steps; for large
    # adapters avoid double-buffering them (saves VMEM on v7x's 64 MiB).
    single_buffer_consts = weight_bytes > (2 << 20)

    def const(shape):
        if single_buffer_consts:
            return pl.BlockSpec(shape, lambda i: (0, 0),
                                pipeline_mode=pl.Buffered(1))
        return pl.BlockSpec(shape, lambda i: (0, 0))

    cost = pl.CostEstimate(
        flops=int(4 * M * D * R),                       # two matmuls
        transcendentals=int(M * R),                     # GELU erf per hidden elt
        bytes_accessed=int(M * D * (bytes_x + bytes_out) + weight_bytes),
    )

    out = pl.pallas_call(
        adapter_kernel,
        out_shape=jax.ShapeDtypeStruct((M, D), x.dtype),
        grid_spec=pltpu.PrefetchScalarGridSpec(
            num_scalar_prefetch=0,
            grid=grid,
            in_specs=[
                row_spec,            # x tile          (TM, D)
                const((D, R)),       # W1^T * gamma    (bf16)
                const((1, R)),       # b1 + beta @ W1^T
                const((R, D)),       # W2^T * 0.7      (bf16)
                const((1, D)),       # b2 * 0.7
            ],
            out_specs=row_spec,      # out tile        (TM, D)
        ),
        compiler_params=pltpu.CompilerParams(
            dimension_semantics=("parallel",),
            vmem_limit_bytes=vmem_limit,
        ),
        cost_estimate=cost,
    )(x2, w1, b1, w2, b2)

    return out.reshape(B, N, D)


# -----------------------------------------------------------------------------
# Parameter construction / folding
# -----------------------------------------------------------------------------
def init_params(key, embed_dims, reduction_dims):
    """Deterministic synthetic init mirroring the module's parameter shapes.

    ln1.weight: (R, D), ln1.bias: (R,); ln2.weight: (D, R), ln2.bias: (D,).
    kaiming_uniform fan_in style bound = gain * sqrt(3 / fan_in), gain ~ sqrt(2).
    Weights returned pre-transposed for row-major matmuls.
    """
    k1, k2, k3, k4 = jax.random.split(key, 4)
    D, R = embed_dims, reduction_dims
    gain = math.sqrt(2.0)

    bound1 = gain * math.sqrt(3.0 / D)
    w1 = jax.random.uniform(k1, (R, D), jnp.float32, -bound1, bound1)
    b1 = 1e-6 * jax.random.normal(k2, (R,), jnp.float32)

    bound2 = gain * math.sqrt(3.0 / R)
    w2 = jax.random.uniform(k3, (D, R), jnp.float32, -bound2, bound2)
    b2 = 1e-6 * jax.random.normal(k4, (D,), jnp.float32)

    return dict(
        gamma=jnp.ones((D,), jnp.float32),
        beta=jnp.zeros((D,), jnp.float32),
        w1_t=w1.T,               # (D, R)
        b1=b1,                   # (R,)
        w2_t=w2.T,               # (R, D)
        b2=b2,                   # (D,)
    )


def prepare_params(p, scale=0.7, compute_dtype=jnp.bfloat16):
    """Fold LN affine into (W1, b1) and the output scale into (W2, b2); cast
    the MXU operands to bf16.  Done once at parameter-construction time."""
    w1_eff = p["gamma"][:, None] * p["w1_t"]           # (D, R)
    b1_eff = p["b1"] + p["beta"] @ p["w1_t"]            # (R,)
    w2_eff = p["w2_t"] * scale                          # (R, D)
    b2_eff = p["b2"] * scale                            # (D,)
    return dict(
        w1=w1_eff.astype(compute_dtype),
        b1=b1_eff.reshape(1, -1).astype(jnp.float32),
        w2=w2_eff.astype(compute_dtype),
        b2=b2_eff.reshape(1, -1).astype(jnp.float32),
    )


# -----------------------------------------------------------------------------
# References
# -----------------------------------------------------------------------------
def adapter_ref(x, p):
    """Pure-JAX f32 reference of the original module semantics."""
    mean = jnp.mean(x, axis=-1, keepdims=True)
    var = jnp.mean((x - mean) ** 2, axis=-1, keepdims=True)
    xn = (x - mean) / jnp.sqrt(var + 1e-5)
    xn = xn * p["gamma"] + p["beta"]
    h = xn @ p["w1_t"] + p["b1"]
    h = 0.5 * h * (1.0 + lax.erf(h / jnp.sqrt(2.0)))
    out = h @ p["w2_t"] + p["b2"]
    return out * 0.7


def adapter_ref_mixed(x, pe):
    """Reference mirroring the kernel's bf16-operand / f32-accumulate numerics."""
    mean = jnp.mean(x, axis=-1, keepdims=True)
    ex2 = jnp.mean(x * x, axis=-1, keepdims=True)
    var = jnp.maximum(ex2 - mean * mean, 0.0)
    xn = (x - mean) * lax.rsqrt(var + 1e-5)
    h = jnp.dot(xn.astype(jnp.bfloat16), pe["w1"],
                preferred_element_type=jnp.float32) + pe["b1"][0]
    h = 0.5 * h * (1.0 + lax.erf(h / jnp.sqrt(2.0)))
    out = jnp.dot(h.astype(jnp.bfloat16), pe["w2"],
                  preferred_element_type=jnp.float32) + pe["b2"][0]
    return out


if __name__ == "__main__":
    B, N, D, R = 2, 8, 32, 16   # batch, tokens, embed_dims, reduction_dims

    key = jax.random.PRNGKey(0)
    kx, kp = jax.random.split(key)
    x = jax.random.normal(kx, (B, N, D), jnp.float32)

    params = init_params(kp, D, R)
    p_eff = prepare_params(params, scale=0.7)   # LN-affine + 0.7 folds, bf16 weights

    y = adapter_forward(x, p_eff["w1"], p_eff["b1"], p_eff["w2"], p_eff["b2"])
    y = jax.block_until_ready(y)
    assert y.shape == (B, N, D)
    assert jnp.all(jnp.isfinite(y))

    # Strict check vs a reference that mirrors the kernel's mixed precision.
    y_mixed = adapter_ref_mixed(x, p_eff)
    err_mixed = jnp.max(jnp.abs(y - y_mixed))
    assert jnp.allclose(y, y_mixed, atol=1e-4, rtol=1e-4), \
        f"mixed-precision mismatch, max abs err {err_mixed}"

    # Semantics check vs the original f32 module, at bf16-operand tolerance.
    y_ref = adapter_ref(x, params)
    err_f32 = jnp.max(jnp.abs(y - y_ref))
    assert jnp.allclose(y, y_ref, atol=5e-2, rtol=5e-2), \
        f"f32-reference mismatch, max abs err {err_f32}"

    print("KERNEL_OK")
</pallas_src>

<mosaic_0001>
module attributes {stable_mosaic.version = 11 : i64} {
  func.func @adapter_kernel(%arg0: i32, %arg1: memref<16x32xf32, #tpu.memory_space<vmem>>, %arg2: memref<32x16xbf16, #tpu.memory_space<vmem>>, %arg3: memref<1x16xf32, #tpu.memory_space<vmem>>, %arg4: memref<16x32xbf16, #tpu.memory_space<vmem>>, %arg5: memref<1x32xf32, #tpu.memory_space<vmem>>, %arg6: memref<16x32xf32, #tpu.memory_space<vmem>>) attributes {dimension_semantics = [#tpu.dimension_semantics<parallel>], iteration_bounds = array<i64: 1>, scalar_prefetch = 0 : i64, scratch_operands = 0 : i64, tpu.core_type = #tpu.core_type<tc>, window_params = [{transform_indices = @transform_0, window_bounds = array<i64: 16, 32>}, {pipeline_mode = #tpu.pipeline_mode<synchronous>, transform_indices = @transform_1, window_bounds = array<i64: 32, 16>}, {pipeline_mode = #tpu.pipeline_mode<synchronous>, transform_indices = @transform_2, window_bounds = array<i64: 1, 16>}, {pipeline_mode = #tpu.pipeline_mode<synchronous>, transform_indices = @transform_3, window_bounds = array<i64: 16, 32>}, {pipeline_mode = #tpu.pipeline_mode<synchronous>, transform_indices = @transform_4, window_bounds = array<i64: 1, 32>}, {transform_indices = @transform_5, window_bounds = array<i64: 16, 32>}]} {
    %c0 = arith.constant 0 : index
    %c0_0 = arith.constant 0 : index
    %0 = vector.load %arg1[%c0, %c0_0] : memref<16x32xf32, #tpu.memory_space<vmem>>, vector<16x32xf32>
    %cst = arith.constant dense<0.000000e+00> : vector<16xf32>
    %1 = vector.multi_reduction <add>, %0, %cst [1] : vector<16x32xf32> to vector<16xf32>
    %2 = vector.shape_cast %1 : vector<16xf32> to vector<16x1xf32>
    %cst_1 = arith.constant 3.200000e+01 : f32
    %3 = vector.broadcast %cst_1 : f32 to vector<16x1xf32>
    %4 = arith.divf %2, %3 : vector<16x1xf32>
    %5 = arith.mulf %0, %0 : vector<16x32xf32>
    %cst_2 = arith.constant dense<0.000000e+00> : vector<16xf32>
    %6 = vector.multi_reduction <add>, %5, %cst_2 [1] : vector<16x32xf32> to vector<16xf32>
    %7 = vector.shape_cast %6 : vector<16xf32> to vector<16x1xf32>
    %cst_3 = arith.constant 3.200000e+01 : f32
    %8 = vector.broadcast %cst_3 : f32 to vector<16x1xf32>
    %9 = arith.divf %7, %8 : vector<16x1xf32>
    %10 = arith.mulf %4, %4 : vector<16x1xf32>
    %11 = arith.subf %9, %10 : vector<16x1xf32>
    %cst_4 = arith.constant 0.000000e+00 : f32
    %12 = vector.broadcast %cst_4 : f32 to vector<16x1xf32>
    %13 = arith.maximumf %11, %12 : vector<16x1xf32>
    %14 = vector.broadcast %4 : vector<16x1xf32> to vector<16x32xf32>
    %15 = arith.subf %0, %14 : vector<16x32xf32>
    %cst_5 = arith.constant 9.99999974E-6 : f32
    %16 = vector.broadcast %cst_5 : f32 to vector<16x1xf32>
    %17 = arith.addf %13, %16 : vector<16x1xf32>
    %18 = math.rsqrt %17 : vector<16x1xf32>
    %19 = vector.broadcast %18 : vector<16x1xf32> to vector<16x32xf32>
    %20 = arith.mulf %15, %19 : vector<16x32xf32>
    %21 = arith.truncf %20 : vector<16x32xf32> to vector<16x32xbf16>
    %c0_6 = arith.constant 0 : index
    %c0_7 = arith.constant 0 : index
    %22 = vector.load %arg2[%c0_6, %c0_7] : memref<32x16xbf16, #tpu.memory_space<vmem>>, vector<32x16xbf16>
    %cst_8 = arith.constant dense<0.000000e+00> : vector<16x16xf32>
    %23 = tpu.matmul %21, %22, %cst_8 {dimension_numbers = #tpu.dot_dimension_numbers<[1], [0], [0], [1], [0, 0, 1, 1], [], []>} : vector<16x32xbf16>, vector<32x16xbf16>, vector<16x16xf32> -> vector<16x16xf32>
    %c0_9 = arith.constant 0 : index
    %c0_10 = arith.constant 0 : index
    %24 = vector.load %arg3[%c0_9, %c0_10] : memref<1x16xf32, #tpu.memory_space<vmem>>, vector<1x16xf32>
    %25 = vector.broadcast %24 : vector<1x16xf32> to vector<16x16xf32>
    %26 = arith.addf %23, %25 : vector<16x16xf32>
    %cst_11 = arith.constant 5.000000e-01 : f32
    %27 = vector.broadcast %cst_11 : f32 to vector<16x16xf32>
    %28 = arith.mulf %27, %26 : vector<16x16xf32>
    %cst_12 = arith.constant 0.707106769 : f32
    %29 = vector.broadcast %cst_12 : f32 to vector<16x16xf32>
    %30 = arith.mulf %26, %29 : vector<16x16xf32>
    %31 = math.erf %30 : vector<16x16xf32>
    %cst_13 = arith.constant 1.000000e+00 : f32
    %32 = vector.broadcast %cst_13 : f32 to vector<16x16xf32>
    %33 = arith.addf %32, %31 : vector<16x16xf32>
    %34 = arith.mulf %28, %33 : vector<16x16xf32>
    %35 = arith.truncf %34 : vector<16x16xf32> to vector<16x16xbf16>
    %c0_14 = arith.constant 0 : index
    %c0_15 = arith.constant 0 : index
    %36 = vector.load %arg4[%c0_14, %c0_15] : memref<16x32xbf16, #tpu.memory_space<vmem>>, vector<16x32xbf16>
    %cst_16 = arith.constant dense<0.000000e+00> : vector<16x32xf32>
    %37 = tpu.matmul %35, %36, %cst_16 {dimension_numbers = #tpu.dot_dimension_numbers<[1], [0], [0], [1], [0, 0, 1, 1], [], []>} : vector<16x16xbf16>, vector<16x32xbf16>, vector<16x32xf32> -> vector<16x32xf32>
    %c0_17 = arith.constant 0 : index
    %c0_18 = arith.constant 0 : index
    %38 = vector.load %arg5[%c0_17, %c0_18] : memref<1x32xf32, #tpu.memory_space<vmem>>, vector<1x32xf32>
    %39 = vector.broadcast %38 : vector<1x32xf32> to vector<16x32xf32>
    %40 = arith.addf %37, %39 : vector<16x32xf32>
    %c0_19 = arith.constant 0 : index
    %c0_20 = arith.constant 0 : index
    %41 = vector.load %arg6[%c0_19, %c0_20] : memref<16x32xf32, #tpu.memory_space<vmem>>, vector<16x32xf32>
    tpu.vector_store %arg6[%c0_19, %c0_20], %40 {strides = array<i32>} : memref<16x32xf32, #tpu.memory_space<vmem>>, vector<16x32xf32>,
    return
  }
  func.func @transform_0(%arg0: i32) -> (i32, i32) {
    %c0_i32 = arith.constant 0 : i32
    %c0_i32_0 = arith.constant 0 : i32
    return %arg0, %c0_i32 : i32, i32
  }
  func.func @transform_1(%arg0: i32) -> (i32, i32) {
    %c0_i32 = arith.constant 0 : i32
    %c0_i32_0 = arith.constant 0 : i32
    %c0_i32_1 = arith.constant 0 : i32
    return %c0_i32, %c0_i32_0 : i32, i32
  }
  func.func @transform_2(%arg0: i32) -> (i32, i32) {
    %c0_i32 = arith.constant 0 : i32
    %c0_i32_0 = arith.constant 0 : i32
    %c0_i32_1 = arith.constant 0 : i32
    return %c0_i32, %c0_i32_0 : i32, i32
  }
  func.func @transform_3(%arg0: i32) -> (i32, i32) {
    %c0_i32 = arith.constant 0 : i32
    %c0_i32_0 = arith.constant 0 : i32
    %c0_i32_1 = arith.constant 0 : i32
    return %c0_i32, %c0_i32_0 : i32, i32
  }
  func.func @transform_4(%arg0: i32) -> (i32, i32) {
    %c0_i32 = arith.constant 0 : i32
    %c0_i32_0 = arith.constant 0 : i32
    %c0_i32_1 = arith.constant 0 : i32
    return %c0_i32, %c0_i32_0 : i32, i32
  }
  func.func @transform_5(%arg0: i32) -> (i32, i32) {
    %c0_i32 = arith.constant 0 : i32
    %c0_i32_0 = arith.constant 0 : i32
    return %arg0, %c0_i32 : i32, i32
  }
}

</mosaic_0001>

<bundles_post_ra>
// kernel: adapter_forward.1
= control target key start
LH: loop header
LB: loop body
LE: loop exit
PB: predicated region body
PF: predicated region fallthrough
CT: control target
= control target key end

     0   :  { %vm24_vm0 = vcmask 261120   ;;  %s356_s0 = inlined_call_operand.vmem [shape: f32[16,32], index: 0, kind: input, shape index: {}]   ;;  %s357_s1 = inlined_call_operand.vmem [shape: bf16[32,16], index: 1, kind: input, shape index: {}]   ;;  %s358_s2 = inlined_call_operand.vmem [shape: f32[1,16], index: 2, kind: input, shape index: {}]   ;;  %s359_s3 = inlined_call_operand.vmem [shape: bf16[16,32], index: 3, kind: input, shape index: {}]   ;;  %s360_s4 = inlined_call_operand.vmem [shape: f32[1,32], index: 4, kind: input, shape index: {}]   ;;  %s361_s5 = inlined_call_operand.hbm [shape: f32[16,32], index: 5, kind: output, shape index: {}]  }
   0x1   :  { %v22_v0 = vld [vmem:[%s356_s0] sm:$0xff]  ;;  %v23_v1 = vld [vmem:[%s356_s0 + $0x8] sm:$0xff] }
   0x2   :  { %v25_v2 = vsel %vm24_vm0, %v22_v0, 0.0  ;;  %v34_v3 = vmul.f32 %v22_v0, %v22_v0  ;;  %v35_v4 = vmul.f32 %v23_v1, %v23_v1  ;;  %v28_v6 = vsel %vm24_vm0, %v23_v1, 0.0 }
   0x3   :  { %26 = vadd.xlane.f32.xlu0 %v25_v2 }
   0x4   :  { %v36_v5 = vsel %vm24_vm0, %v34_v3, 0.0 }
   0x5   :  { %10 = vsyncpa [#allocation3], 0  ;;  %37 = vadd.xlane.f32.xlu1 %v36_v5  ;;  %v39_v7 = vsel %vm24_vm0, %v35_v4, 0.0  ;;  %v246_v8 = vld [vmem:[%s357_s1] sm:$0xff]   ;;  %v281_v9 = vmov 0.0   ;;  %vm282_vm1 = vmmov 0  }
   0x6   :  { %227 = vmatprep.subr.bf16.mxu0 %v281_v9  ;;  %231 = vmatprep.mubr.msk.bf16.mxu0 %vm282_vm1, %v281_v9  ;;  %v247_v10 = vld [vmem:[%s357_s1 + $0x8] sm:$0xff]   ;;  %v248_v34 = vld [vmem:[%s359_s3] sm:$0xff]   ;;  %vm152_vm2 = vcmask 130048   ;;  %s283_s28 = smov [#allocation2]  }
   0x7   :  { %29 = vadd.xlane.f32.xlu0 %v28_v6  ;;  %228 = vmatpush3.bf16.msra.mxu0 %v246_v8  ;;  %v215_v35 = vld [vmem:[%s358_s2] ss:$0 sm:$0xff]  ;;  %s204_s29 = sshll.u32 %s283_s28, 4  ;;  %s205_s29 = int_to_ptr.vmem [resolvable:$true] %s204_s29 }
   0x8   :  { %235 = vmatprep.subr.bf16.mxu1 %v281_v9  ;;  %229 = vmatprep.subr.bf16.mxu0 %v281_v9  ;;  %v219_v53 = vld [vmem:[%s360_s4] ss:$0 sm:$0xff]  ;;  %s257_s30 = scalar_lea.vmem %s205_s29, 256  ;;  %p262_p1 = scmp.lt.s32.totalorder %s205_s29, %s205_s29 }
   0x9   :  { %40 = vadd.xlane.f32.xlu1 %v39_v7  ;;  %237 = vmatprep.mubr.msk.bf16.mxu1 %vm282_vm1, %v281_v9  ;;  %p258_p0 = scmp.ne.s32.totalorder %s205_s29, %s257_s30  ;;  %p263_p2 = scmp.lt.s32.totalorder %s257_s30, %s257_s30 }
   0xa   :  { %236 = vmatpush3.bf16.msra.mxu1 %v248_v34 }
   0xb   :  { %230 = vmatpush3.bf16.msra.mxu0 %v247_v10  ;;  %p264_p3 = por %p263_p2, %p262_p1 }
   0xd   :  { %p265_p4 = pnand %p264_p3, %p258_p0 }
  0x90   :  { %v27_v11 = vpop.xlane.xlu0 %26 }
  0x91   :  { %v32_v12 = vmul.f32 0.03125, %v27_v11 }
  0x92   :  { %v38_v13 = vpop.xlane.xlu1 %37 }
  0x93   :  { %v44_v14 = vmul.f32 %v32_v12, %v32_v12  ;;  %v42_v15 = vmul.f32 0.03125, %v38_v13  ;;  %v50_v28 = vsub.f32 %v22_v0, %v32_v12 }
  0x94   :  { %v30_v16 = vpop.xlane.xlu0 %29 }
  0x95   :  { %v46_v17 = vsub.f32 %v42_v15, %v44_v14  ;;  %v33_v18 = vmul.f32 0.03125, %v30_v16 }
  0x96   :  { %v41_v19 = vpop.xlane.xlu1 %40 }
  0x97   :  { %v48_v20 = vmax.f32 %v46_v17, 0.0  ;;  %v45_v21 = vmul.f32 %v33_v18, %v33_v18  ;;  %v43_v22 = vmul.f32 0.03125, %v41_v19  ;;  %v51_v29 = vsub.f32 %v23_v1, %v33_v18 }
  0x99   :  { %v52_v23 = vadd.f32 1e-05, %v48_v20  ;;  %v47_v24 = vsub.f32 %v43_v22, %v45_v21 }
  0x9b   :  { %v49_v25 = vmax.f32 %v47_v24, 0.0  ;;  %249 = vrsqrt.f32 %v52_v23 }
  0x9d   :  { %v53_v26 = vadd.f32 1e-05, %v49_v25 }
  0x9f   :  { %251 = vrsqrt.f32 %v53_v26 }
  0xa5   :  { %v250_v27 = vpop.eup %249 }
  0xa6   :  { %v56_v31 = vmul.f32 %v250_v27, %v50_v28 }
  0xa9   :  { %v252_v30 = vpop.eup %251 }
  0xaa   :  { %v57_v32 = vmul.f32 %v252_v30, %v51_v29 }
  0xac   :  { %v58_v33 = vpack.c.bf16 %v57_v32, %v56_v31 }
  0xae   :  { %232 = vmatmul.mubr.msk.bf16.vlgmr.msra.gmra.mrb[0].mxu0 %vm24_vm0, %v58_v33 }
 0x181   :  { %v119_v36 = vpop.f32.mrb[0].mxu0 }
 0x182   :  { %v120_v37 = vadd.f32 %v215_v35, %v119_v36  ;;  %v233_v38 = vpop.f32.mrb[1].mxu0 }
 0x183   :  { %v122_v39 = vpop.f32.mrb[2].mxu0 }
 0x184   :  { %v128_v40 = vmul.f32 0.70710677, %v120_v37  ;;  %v123_v41 = vadd.f32 %v215_v35, %v122_v39  ;;  %v234_v42 = vpop.f32.mrb[3].mxu0  ;;  %v126_v47 = vmul.f32 0.5, %v120_v37 }
 0x186   :  { %253 = verf.f32 %v128_v40  ;;  %v129_v43 = vmul.f32 0.70710677, %v123_v41  ;;  %v127_v48 = vmul.f32 0.5, %v123_v41 }
 0x188   :  { %255 = verf.f32 %v129_v43 }
 0x190   :  { %v254_v44 = vpop.eup %253 }
 0x191   :  { %v132_v45 = vadd.f32 1.0, %v254_v44 }
 0x192   :  { %v256_v46 = vpop.eup %255 }
 0x193   :  { %v133_v49 = vadd.f32 1.0, %v256_v46  ;;  %v134_v50 = vmul.f32 %v132_v45, %v126_v47 }
 0x195   :  { %v135_v51 = vmul.f32 %v133_v49, %v127_v48 }
 0x197   :  { %v136_v52 = vpack.c.bf16 %v135_v51, %v134_v50 }
 0x199   :  { %238 = vmatmul.mubr.msk.bf16.vlgmr.msra.gmra.mrb[0].mxu1 %vm152_vm2, %v136_v52 }
 0x26c   :  { %v190_v54 = vpop.f32.mrb[0].mxu1 }
 0x26d   :  { %v191_v55 = vadd.f32 %v219_v53, %v190_v54  ;;  %v239_v56 = vpop.f32.mrb[1].mxu1 }
 0x26e   :  { %v193_v57 = vpop.f32.mrb[2].mxu1 }
 0x26f   :  { %197 = vst.msk [vmem:[#allocation2] sm:$0xff] %vm24_vm0, %v191_v55  ;;  %v194_v58 = vadd.f32 %v219_v53, %v193_v57  ;;  %v240_v59 = vpop.f32.mrb[3].mxu1 }
 0x271   :  { %198 = vst.msk [vmem:[#allocation2 + $0x8] sm:$0xff] %vm24_vm0, %v194_v58 }
 0x272   :  { %268 = shalt.err (!%p265_p4)
}
 0x273   :  { %s269_s7 = scalar_lea.hbm %s361_s5, 256 }
 0x274   :  { %p270_p5 = scmp.ne.s32.totalorder %s361_s5, %s269_s7  ;;  %p273_p6 = scmp.lt.u32.totalorder %s269_s7, %s361_s5 }
 0x276   :  { %p275_p7 = pnand %p273_p6, %p270_p5 }
 0x278   :  { %278 = shalt.err (!%p275_p7)
}
 0x279   :  { %s284_s12 = smov 128   ;;  %s285_s13 = smov 8  }
 0x27a   :  { %210 = dma.vmem_to_hbm [thread:$0]  %s205_s29, 256, %s361_s5, [#allocation3], %s284_s12, %s284_s12, %s285_s13  }
 0x27b   :  { %279 = dma.done.wait [#allocation3], 256  }
 0x27c   :  { %280 = vsyncadd [#allocation3], 4294967040 }
 0x27d   :  { %214 = vsyncpa [#allocation3], 1 }

</bundles_post_ra>
